<compile_context>
chip_gen: v7x
topology: tpu7x:2x2x1
jax: 0.10.0
libtpu: 0.0.40
codegen_flags: <defaults>
</compile_context>

<pallas_src>
import jax
import jax.numpy as jnp
from jax.experimental import pallas as pl
from jax.experimental.pallas import tpu as pltpu


def _round_up(x, m):
    return (x + m - 1) // m * m


def _mul_kernel(g_ref, x_ref, o_ref):
    # Dense elementwise multiply; gate already sigmoided/broadcast in wrapper.
    o_ref[...] = x_ref[...] * g_ref[...]


def _gated_mul_kernel(gate_ref, x_ref, o_ref):
    # gate_ref: (tc, 1)   x_ref / o_ref: (tc, HW) with HW >= 128 (lane-dense).
    g = jax.nn.sigmoid(gate_ref[...].astype(jnp.float32)).astype(x_ref.dtype)
    o_ref[...] = x_ref[...] * g  # (tc, 1) broadcasts over lanes


def _pick_channels_per_row(nc, hw, itemsize, max_row_bytes=256 * 1024):
    """Channels-per-row G (divisor of nc) so cols = G*hw is lane-dense while
    rows = nc//G stays large enough to tile and each row stays DMA-friendly."""
    best_g, best_density = 1, 0.0
    for g in range(1, nc + 1):
        if nc % g:
            continue
        cols = g * hw
        if cols * itemsize > max_row_bytes and best_g > 1:
            break
        density = cols / _round_up(cols, 128)
        if density > best_density + 1e-9:
            best_g, best_density = g, density
        if best_density >= 0.98:
            break
    return best_g


def _pick_row_tile(rows, row_bytes_x, row_bytes_gate, budget_bytes):
    """Multiple-of-8 row tile: fits the double-buffered (x + gate + out)
    working set in `budget_bytes`, targets ~1 MiB x-blocks for DMA bursts,
    and keeps >=4 grid steps for large inputs (v7x megacore / pipelining)."""
    per_row = 2 * (2 * row_bytes_x + row_bytes_gate)  # dbl-buffered x, out, gate
    tc_budget = max(8, (budget_bytes // per_row) // 8 * 8)
    tc_target = max(8, ((1 << 20) // max(row_bytes_x, 1)) // 8 * 8)
    tc = min(tc_budget, tc_target)

    total_x_bytes = rows * row_bytes_x
    if total_x_bytes > (2 << 20):
        quarter = (rows // 4) // 8 * 8
        if quarter >= 8:
            tc = min(tc, quarter)

    tc = min(tc, _round_up(rows, 8))
    return max(tc, 8)


def sigmoid_mul(x334, x330, *, vmem_budget_bytes=12 * 1024 * 1024):
    """x334: (N, C, 1, 1) gate logits; x330: (N, C, H, W) features."""
    N, C, H, W = x330.shape
    assert x334.shape == (N, C, 1, 1)
    NC, HW = N * C, H * W
    dtype = x330.dtype
    itemsize = jnp.dtype(dtype).itemsize

    if HW >= 128:
        # Spatial axis already lane-dense: keep the gate tiny and do the
        # sigmoid + lane broadcast in-kernel (no extra gate-slab HBM traffic).
        rows, cols = NC, HW
        x2d = x330.reshape(rows, cols)                     # zero-copy view
        g2d = x334.reshape(rows, 1)
        row_bytes_x = _round_up(cols, 128) * itemsize
        row_bytes_g = 128 * jnp.dtype(x334.dtype).itemsize  # (tc,1) lane-pads
        tc = _pick_row_tile(rows, row_bytes_x, row_bytes_g, vmem_budget_bytes)
        in_specs = [
            pl.BlockSpec((tc, 1), lambda i: (i, 0)),
            pl.BlockSpec((tc, cols), lambda i: (i, 0)),
        ]
        kernel = _gated_mul_kernel
    else:
        # HW < 128: pack G channels per row so the last dim is lane-dense.
        # Zero-copy reshape of the contiguous NCHW feature buffer; the tiny
        # gate is sigmoided in f32 and broadcast to the same slab shape in
        # the wrapper (a few-KiB XLA fusion), so the kernel does unmasked
        # full-lane stores and long contiguous DMA bursts.
        G = _pick_channels_per_row(NC, HW, itemsize)
        rows, cols = NC // G, G * HW
        x2d = x330.reshape(rows, cols)                     # zero-copy view
        gate = jax.nn.sigmoid(x334.astype(jnp.float32)).astype(dtype)
        g2d = jnp.broadcast_to(gate, (N, C, H, W)).reshape(rows, cols)
        row_bytes_x = _round_up(cols, 128) * itemsize
        row_bytes_g = row_bytes_x
        tc = _pick_row_tile(rows, row_bytes_x, row_bytes_g, vmem_budget_bytes)
        in_specs = [
            pl.BlockSpec((tc, cols), lambda i: (i, 0)),
            pl.BlockSpec((tc, cols), lambda i: (i, 0)),
        ]
        kernel = _mul_kernel

    grid = (pl.cdiv(rows, tc),)

    # VMEM limit tied to the actual working set (+ headroom), portable across
    # v5e / v6e / v7x scoped-VMEM defaults.
    working_set = 2 * tc * (2 * row_bytes_x + row_bytes_g)
    vmem_limit = int(min(max(working_set + (2 << 20), 4 << 20), 32 << 20))

    out = pl.pallas_call(
        kernel,
        out_shape=jax.ShapeDtypeStruct((rows, cols), dtype),
        grid_spec=pltpu.PrefetchScalarGridSpec(
            num_scalar_prefetch=0,
            grid=grid,
            in_specs=in_specs,
            out_specs=pl.BlockSpec((tc, cols), lambda i: (i, 0)),
        ),
        compiler_params=pltpu.CompilerParams(
            dimension_semantics=("parallel",),
            vmem_limit_bytes=vmem_limit,
        ),
    )(g2d, x2d)

    return out.reshape(N, C, H, W)


if __name__ == "__main__":
    key = jax.random.PRNGKey(0)
    k1, k2, k3, k4 = jax.random.split(key, 4)

    # 1) Shipped module shapes: x330 (1,960,7,7), x334 (1,960,1,1)
    #    (exercises the lane-packed HW<128 path; single dense grid step).
    x330 = jax.random.normal(k1, (1, 960, 7, 7), dtype=jnp.float32)
    x334 = jax.random.normal(k2, (1, 960, 1, 1), dtype=jnp.float32)
    out = jax.block_until_ready(sigmoid_mul(x334, x330))
    ref = x330 * jax.nn.sigmoid(x334)
    assert out.shape == (1, 960, 7, 7)
    assert jnp.allclose(out, ref, atol=1e-6, rtol=1e-6)

    # 2) Small shape with lane-dense spatial dim (HW >= 128 in-kernel gate path).
    xs = jax.random.normal(k3, (2, 32, 16, 16), dtype=jnp.float32)
    gs = jax.random.normal(k4, (2, 32, 1, 1), dtype=jnp.float32)
    out2 = jax.block_until_ready(sigmoid_mul(gs, xs))
    ref2 = xs * jax.nn.sigmoid(gs)
    assert jnp.allclose(out2, ref2, atol=1e-6, rtol=1e-6)

    # 3) Multi-step grid path: tiny budget forces row tiling + partial blocks.
    out3 = jax.block_until_ready(
        sigmoid_mul(x334, x330, vmem_budget_bytes=64 * 1024))
    assert jnp.allclose(out3, ref, atol=1e-6, rtol=1e-6)

    print("KERNEL_OK")
</pallas_src>

<mosaic_0001>
module attributes {stable_mosaic.version = 11 : i64} {
  func.func @_mul_kernel(%arg0: i32, %arg1: memref<16x2940xf32, #tpu.memory_space<vmem>>, %arg2: memref<16x2940xf32, #tpu.memory_space<vmem>>, %arg3: memref<16x2940xf32, #tpu.memory_space<vmem>>) attributes {dimension_semantics = [#tpu.dimension_semantics<parallel>], iteration_bounds = array<i64: 1>, scalar_prefetch = 0 : i64, scratch_operands = 0 : i64, tpu.core_type = #tpu.core_type<tc>, window_params = [{transform_indices = @transform_0, window_bounds = array<i64: 16, 2940>}, {transform_indices = @transform_1, window_bounds = array<i64: 16, 2940>}, {transform_indices = @transform_2, window_bounds = array<i64: 16, 2940>}]} {
    %c0 = arith.constant 0 : index
    %c0_0 = arith.constant 0 : index
    %0 = vector.load %arg2[%c0, %c0_0] : memref<16x2940xf32, #tpu.memory_space<vmem>>, vector<16x2940xf32>
    %c0_1 = arith.constant 0 : index
    %c0_2 = arith.constant 0 : index
    %1 = vector.load %arg1[%c0_1, %c0_2] : memref<16x2940xf32, #tpu.memory_space<vmem>>, vector<16x2940xf32>
    %2 = arith.mulf %0, %1 : vector<16x2940xf32>
    %c0_3 = arith.constant 0 : index
    %c0_4 = arith.constant 0 : index
    %3 = vector.load %arg3[%c0_3, %c0_4] : memref<16x2940xf32, #tpu.memory_space<vmem>>, vector<16x2940xf32>
    tpu.vector_store %arg3[%c0_3, %c0_4], %2 {strides = array<i32>} : memref<16x2940xf32, #tpu.memory_space<vmem>>, vector<16x2940xf32>,
    return
  }
  func.func @transform_0(%arg0: i32) -> (i32, i32) {
    %c0_i32 = arith.constant 0 : i32
    %c0_i32_0 = arith.constant 0 : i32
    return %arg0, %c0_i32 : i32, i32
  }
  func.func @transform_1(%arg0: i32) -> (i32, i32) {
    %c0_i32 = arith.constant 0 : i32
    %c0_i32_0 = arith.constant 0 : i32
    return %arg0, %c0_i32 : i32, i32
  }
  func.func @transform_2(%arg0: i32) -> (i32, i32) {
    %c0_i32 = arith.constant 0 : i32
    %c0_i32_0 = arith.constant 0 : i32
    return %arg0, %c0_i32 : i32, i32
  }
}

</mosaic_0001>

<bundles_post_ra>
// kernel: tpu_custom_call.1
= control target key start
LH: loop header
LB: loop body
LE: loop exit
PB: predicated region body
PF: predicated region fallthrough
CT: control target
= control target key end

     0   :  { %7 = vsyncpa [#allocation3], 0  ;;  %s387_s0 = inlined_call_operand.hbm [shape: f32[16,2940], index: 0, kind: input, shape index: {}]   ;;  %s388_s1 = inlined_call_operand.hbm [shape: f32[16,2940], index: 1, kind: input, shape index: {}]   ;;  %s389_s2 = inlined_call_operand.hbm [shape: f32[16,2940], index: 2, kind: output, shape index: {}]  }
   0x1   :  { %8 = vsyncpa [#allocation6], 0 }
   0x2   :  { %9 = vsyncpa [#allocation4], 0  ;;  %s320_s9 = smov [#allocation2]   ;;  %s248_s13 = scalar_lea.hbm %s387_s0, 5888 }
   0x3   :  { %s15_s10 = sshll.u32 %s320_s9, 4  ;;  %p249_p0 = scmp.ne.s32.totalorder %s387_s0, %s248_s13  ;;  %s16_s10 = int_to_ptr.vmem [resolvable:$true] %s15_s10 }
   0x4   :  { %p252_p1 = scmp.lt.u32.totalorder %s248_s13, %s387_s0 }
   0x6   :  { %p254_p2 = pnand %p252_p1, %p249_p0 }
   0x8   :  { %257 = shalt.err (!%p254_p2)
}
   0x9   :  { %s258_s18 = scalar_lea.vmem %s16_s10, 5888  ;;  %p263_p4 = scmp.lt.s32.totalorder %s16_s10, %s16_s10 }
   0xa   :  { %p259_p3 = scmp.ne.s32.totalorder %s16_s10, %s258_s18  ;;  %p264_p5 = scmp.lt.s32.totalorder %s258_s18, %s258_s18 }
   0xc   :  { %p265_p6 = por %p264_p5, %p263_p4 }
   0xe   :  { %p266_p7 = pnand %p265_p6, %p259_p3 }
  0x10   :  { %269 = shalt.err (!%p266_p7)
}
  0x11   :  { %s321_s19 = smov 2944   ;;  %s322_s20 = smov 184  }
  0x12   :  { %21 = dma.hbm_to_vmem [thread:$0]  %s387_s0, 5888, %s16_s10, [#allocation3], %s321_s19, %s321_s19, %s322_s20  }
  0x13   :  { %s323_s23 = smov [#allocation5]   ;;  %s270_s27 = scalar_lea.hbm %s388_s1, 5888 }
  0x14   :  { %s27_s24 = sshll.u32 %s323_s23, 4  ;;  %p271_p8 = scmp.ne.s32.totalorder %s388_s1, %s270_s27  ;;  %s28_s24 = int_to_ptr.vmem [resolvable:$true] %s27_s24 }
  0x15   :  { %p274_p9 = scmp.lt.u32.totalorder %s270_s27, %s388_s1 }
  0x17   :  { %p276_p10 = pnand %p274_p9, %p271_p8 }
  0x19   :  { %279 = shalt.err (!%p276_p10)
}
  0x1a   :  { %s280_s4 = scalar_lea.vmem %s28_s24, 5888  ;;  %p285_p12 = scmp.lt.s32.totalorder %s28_s24, %s28_s24 }
  0x1b   :  { %p281_p11 = scmp.ne.s32.totalorder %s28_s24, %s280_s4  ;;  %p286_p13 = scmp.lt.s32.totalorder %s280_s4, %s280_s4 }
  0x1d   :  { %p287_p0 = por %p286_p13, %p285_p12 }
  0x1f   :  { %p288_p1 = pnand %p287_p0, %p281_p11 }
  0x21   :  { %291 = shalt.err (!%p288_p1)
}
  0x22   :  { %33 = dma.hbm_to_vmem [thread:$0]  %s388_s1, 5888, %s28_s24, [#allocation6], %s321_s19, %s321_s19, %s322_s20  }
  0x23   :  { %314 = dma.done.wait [#allocation3], 5888  }
  0x24   :  { %315 = vsyncadd [#allocation3], 4294961408 }
  0x25   :  { %316 = dma.done.wait [#allocation6], 5888  }
  0x26   :  { %317 = vsyncadd [#allocation6], 4294961408  ;;  %v40_v0 = vld [vmem:[#allocation5] sm:$0xff]  ;;  %v86_v1 = vld [vmem:[#allocation2] sm:$0xff]  ;;  %vm200_vm0 = vcmask 1014784   ;;  %s324_s1 = smov [#allocation7]  }
  0x27   :  { %v41_v2 = vld [vmem:[#allocation5 + $0x8] sm:$0xff]  ;;  %v132_v3 = vmul.f32 %v86_v1, %v40_v0  ;;  %v87_v4 = vld [vmem:[#allocation2 + $0x8] sm:$0xff]  ;;  %v42_v5 = vld [vmem:[#allocation5 + $0x10] sm:$0xff]  ;;  %s230_s6 = sshll.u32 %s324_s1, 4  ;;  %s231_s6 = int_to_ptr.vmem [resolvable:$true] %s230_s6 }
  0x28   :  { %v88_v6 = vld [vmem:[#allocation2 + $0x10] sm:$0xff]  ;;  %v133_v7 = vmul.f32 %v87_v4, %v41_v2  ;;  %v43_v9 = vld [vmem:[#allocation5 + $0x18] sm:$0xff]  ;;  %v89_v10 = vld [vmem:[#allocation2 + $0x18] sm:$0xff]  ;;  %s292_s7 = scalar_lea.vmem %s231_s6, 5888  ;;  %p297_p3 = scmp.lt.s32.totalorder %s231_s6, %s231_s6 }
  0x29   :  { %v134_v8 = vmul.f32 %v88_v6, %v42_v5  ;;  %v44_v11 = vld [vmem:[#allocation5 + $0x20] sm:$0xff]  ;;  %178 = vst [vmem:[#allocation7] sm:$0xff] %v132_v3  ;;  %v135_v12 = vmul.f32 %v89_v10, %v43_v9  ;;  %v90_v13 = vld [vmem:[#allocation2 + $0x20] sm:$0xff]  ;;  %v45_v14 = vld [vmem:[#allocation5 + $0x28] sm:$0xff]  ;;  %p293_p2 = scmp.ne.s32.totalorder %s231_s6, %s292_s7  ;;  %p298_p4 = scmp.lt.s32.totalorder %s292_s7, %s292_s7 }
  0x2a   :  { %v91_v15 = vld [vmem:[#allocation2 + $0x28] sm:$0xff]  ;;  %179 = vst [vmem:[#allocation7 + $0x8] sm:$0xff] %v133_v7  ;;  %v136_v16 = vmul.f32 %v90_v13, %v44_v11  ;;  %v46_v18 = vld [vmem:[#allocation5 + $0x30] sm:$0xff]  ;;  %v92_v19 = vld [vmem:[#allocation2 + $0x30] sm:$0xff] }
  0x2b   :  { %180 = vst [vmem:[#allocation7 + $0x10] sm:$0xff] %v134_v8  ;;  %v137_v17 = vmul.f32 %v91_v15, %v45_v14  ;;  %v47_v20 = vld [vmem:[#allocation5 + $0x38] sm:$0xff]  ;;  %181 = vst [vmem:[#allocation7 + $0x18] sm:$0xff] %v135_v12  ;;  %v138_v21 = vmul.f32 %v92_v19, %v46_v18  ;;  %v93_v22 = vld [vmem:[#allocation2 + $0x38] sm:$0xff]  ;;  %p299_p5 = por %p298_p4, %p297_p3 }
  0x2c   :  { %v48_v23 = vld [vmem:[#allocation5 + $0x40] sm:$0xff]  ;;  %v94_v24 = vld [vmem:[#allocation2 + $0x40] sm:$0xff]  ;;  %182 = vst [vmem:[#allocation7 + $0x20] sm:$0xff] %v136_v16  ;;  %v139_v25 = vmul.f32 %v93_v22, %v47_v20  ;;  %v49_v27 = vld [vmem:[#allocation5 + $0x48] sm:$0xff] }
  0x2d   :  { %183 = vst [vmem:[#allocation7 + $0x28] sm:$0xff] %v137_v17  ;;  %v140_v26 = vmul.f32 %v94_v24, %v48_v23  ;;  %v95_v28 = vld [vmem:[#allocation2 + $0x48] sm:$0xff]  ;;  %v50_v29 = vld [vmem:[#allocation5 + $0x50] sm:$0xff]  ;;  %184 = vst [vmem:[#allocation7 + $0x30] sm:$0xff] %v138_v21  ;;  %p300_p6 = pnand %p299_p5, %p293_p2 }
  0x2e   :  { %v141_v30 = vmul.f32 %v95_v28, %v49_v27  ;;  %v96_v31 = vld [vmem:[#allocation2 + $0x50] sm:$0xff]  ;;  %v51_v32 = vld [vmem:[#allocation5 + $0x58] sm:$0xff]  ;;  %v97_v33 = vld [vmem:[#allocation2 + $0x58] sm:$0xff]  ;;  %185 = vst [vmem:[#allocation7 + $0x38] sm:$0xff] %v139_v25 }
  0x2f   :  { %186 = vst [vmem:[#allocation7 + $0x40] sm:$0xff] %v140_v26  ;;  %v142_v34 = vmul.f32 %v96_v31, %v50_v29  ;;  %v143_v35 = vmul.f32 %v97_v33, %v51_v32  ;;  %v52_v36 = vld [vmem:[#allocation5 + $0x60] sm:$0xff]  ;;  %v98_v37 = vld [vmem:[#allocation2 + $0x60] sm:$0xff]  ;;  %v53_v38 = vld [vmem:[#allocation5 + $0x68] sm:$0xff] }
  0x30   :  { %187 = vst [vmem:[#allocation7 + $0x48] sm:$0xff] %v141_v30  ;;  %v144_v39 = vmul.f32 %v98_v37, %v52_v36  ;;  %v99_v40 = vld [vmem:[#allocation2 + $0x68] sm:$0xff]  ;;  %v54_v41 = vld [vmem:[#allocation5 + $0x70] sm:$0xff]  ;;  %v100_v42 = vld [vmem:[#allocation2 + $0x70] sm:$0xff] }
  0x31   :  { %188 = vst [vmem:[#allocation7 + $0x50] sm:$0xff] %v142_v34  ;;  %189 = vst [vmem:[#allocation7 + $0x58] sm:$0xff] %v143_v35  ;;  %v145_v43 = vmul.f32 %v99_v40, %v53_v38  ;;  %v146_v44 = vmul.f32 %v100_v42, %v54_v41  ;;  %v55_v45 = vld [vmem:[#allocation5 + $0x78] sm:$0xff]  ;;  %v101_v46 = vld [vmem:[#allocation2 + $0x78] sm:$0xff] }
  0x32   :  { %v56_v47 = vld [vmem:[#allocation5 + $0x80] sm:$0xff]  ;;  %190 = vst [vmem:[#allocation7 + $0x60] sm:$0xff] %v144_v39  ;;  %v147_v48 = vmul.f32 %v101_v46, %v55_v45  ;;  %v102_v49 = vld [vmem:[#allocation2 + $0x80] sm:$0xff]  ;;  %v57_v50 = vld [vmem:[#allocation5 + $0x88] sm:$0xff] }
  0x33   :  { %v103_v51 = vld [vmem:[#allocation2 + $0x88] sm:$0xff]  ;;  %191 = vst [vmem:[#allocation7 + $0x68] sm:$0xff] %v145_v43  ;;  %192 = vst [vmem:[#allocation7 + $0x70] sm:$0xff] %v146_v44  ;;  %v148_v52 = vmul.f32 %v102_v49, %v56_v47  ;;  %v58_v54 = vld [vmem:[#allocation5 + $0x90] sm:$0xff] }
  0x34   :  { %v149_v53 = vmul.f32 %v103_v51, %v57_v50  ;;  %v104_v55 = vld [vmem:[#allocation2 + $0x90] sm:$0xff]  ;;  %v59_v56 = vld [vmem:[#allocation5 + $0x98] sm:$0xff]  ;;  %193 = vst [vmem:[#allocation7 + $0x78] sm:$0xff] %v147_v48  ;;  %v105_v58 = vld [vmem:[#allocation2 + $0x98] sm:$0xff] }
  0x35   :  { %v150_v57 = vmul.f32 %v104_v55, %v58_v54  ;;  %v60_v59 = vld [vmem:[#allocation5 + $0xa0] sm:$0xff]  ;;  %v106_v60 = vld [vmem:[#allocation2 + $0xa0] sm:$0xff]  ;;  %194 = vst [vmem:[#allocation7 + $0x80] sm:$0xff] %v148_v52  ;;  %v151_v61 = vmul.f32 %v105_v58, %v59_v56  ;;  %v61_v63 = vld [vmem:[#allocation5 + $0xa8] sm:$0xff] }
  0x36   :  { %195 = vst [vmem:[#allocation7 + $0x88] sm:$0xff] %v149_v53  ;;  %v152_v62 = vmul.f32 %v106_v60, %v60_v59  ;;  %v107_v0 = vld [vmem:[#allocation2 + $0xa8] sm:$0xff]  ;;  %v62_v1 = vld [vmem:[#allocation5 + $0xb0] sm:$0xff]  ;;  %v108_v3 = vld [vmem:[#allocation2 + $0xb0] sm:$0xff] }
  0x37   :  { %196 = vst [vmem:[#allocation7 + $0x90] sm:$0xff] %v150_v57  ;;  %v153_v2 = vmul.f32 %v107_v0, %v61_v63  ;;  %v63_v4 = vld [vmem:[#allocation5 + $0xb8] sm:$0xff]  ;;  %v109_v5 = vld [vmem:[#allocation2 + $0xb8] sm:$0xff]  ;;  %197 = vst [vmem:[#allocation7 + $0x98] sm:$0xff] %v151_v61  ;;  %v154_v6 = vmul.f32 %v108_v3, %v62_v1 }
  0x38   :  { %198 = vst [vmem:[#allocation7 + $0xa0] sm:$0xff] %v152_v62  ;;  %v155_v7 = vmul.f32 %v109_v5, %v63_v4  ;;  %v64_v8 = vld [vmem:[#allocation5 + $0xc0] sm:$0xff]  ;;  %v110_v9 = vld [vmem:[#allocation2 + $0xc0] sm:$0xff]  ;;  %v65_v10 = vld [vmem:[#allocation5 + $0xc8] sm:$0xff] }
  0x39   :  { %199 = vst [vmem:[#allocation7 + $0xa8] sm:$0xff] %v153_v2  ;;  %v156_v11 = vmul.f32 %v110_v9, %v64_v8  ;;  %v111_v12 = vld [vmem:[#allocation2 + $0xc8] sm:$0xff]  ;;  %v66_v13 = vld [vmem:[#allocation5 + $0xd0] sm:$0xff]  ;;  %v112_v14 = vld [vmem:[#allocation2 + $0xd0] sm:$0xff] }
  0x3a   :  { %201 = vst.msk [vmem:[#allocation7 + $0xb0] sm:$0xff] %vm200_vm0, %v154_v6  ;;  %202 = vst [vmem:[#allocation7 + $0xb8] sm:$0xff] %v155_v7  ;;  %v157_v15 = vmul.f32 %v111_v12, %v65_v10  ;;  %v158_v16 = vmul.f32 %v112_v14, %v66_v13  ;;  %v67_v17 = vld [vmem:[#allocation5 + $0xd8] sm:$0xff]  ;;  %v113_v18 = vld [vmem:[#allocation2 + $0xd8] sm:$0xff] }
  0x3b   :  { %v68_v19 = vld [vmem:[#allocation5 + $0xe0] sm:$0xff]  ;;  %203 = vst [vmem:[#allocation7 + $0xc0] sm:$0xff] %v156_v11  ;;  %v159_v20 = vmul.f32 %v113_v18, %v67_v17  ;;  %v114_v21 = vld [vmem:[#allocation2 + $0xe0] sm:$0xff]  ;;  %v69_v22 = vld [vmem:[#allocation5 + $0xe8] sm:$0xff] }
  0x3c   :  { %v115_v23 = vld [vmem:[#allocation2 + $0xe8] sm:$0xff]  ;;  %204 = vst [vmem:[#allocation7 + $0xc8] sm:$0xff] %v157_v15  ;;  %205 = vst [vmem:[#allocation7 + $0xd0] sm:$0xff] %v158_v16  ;;  %v160_v24 = vmul.f32 %v114_v21, %v68_v19  ;;  %v70_v26 = vld [vmem:[#allocation5 + $0xf0] sm:$0xff] }
  0x3d   :  { %v161_v25 = vmul.f32 %v115_v23, %v69_v22  ;;  %v116_v27 = vld [vmem:[#allocation2 + $0xf0] sm:$0xff]  ;;  %v71_v28 = vld [vmem:[#allocation5 + $0xf8] sm:$0xff]  ;;  %206 = vst [vmem:[#allocation7 + $0xd8] sm:$0xff] %v159_v20  ;;  %v117_v30 = vld [vmem:[#allocation2 + $0xf8] sm:$0xff] }
  0x3e   :  { %v162_v29 = vmul.f32 %v116_v27, %v70_v26  ;;  %v72_v31 = vld [vmem:[#allocation5 + $0x100] sm:$0xff]  ;;  %v118_v32 = vld [vmem:[#allocation2 + $0x100] sm:$0xff]  ;;  %207 = vst [vmem:[#allocation7 + $0xe0] sm:$0xff] %v160_v24  ;;  %v163_v33 = vmul.f32 %v117_v30, %v71_v28  ;;  %v73_v35 = vld [vmem:[#allocation5 + $0x108] sm:$0xff] }
  0x3f   :  { %208 = vst [vmem:[#allocation7 + $0xe8] sm:$0xff] %v161_v25  ;;  %v164_v34 = vmul.f32 %v118_v32, %v72_v31  ;;  %v119_v36 = vld [vmem:[#allocation2 + $0x108] sm:$0xff]  ;;  %v74_v37 = vld [vmem:[#allocation5 + $0x110] sm:$0xff]  ;;  %v120_v39 = vld [vmem:[#allocation2 + $0x110] sm:$0xff] }
  0x40   :  { %209 = vst [vmem:[#allocation7 + $0xf0] sm:$0xff] %v162_v29  ;;  %v165_v38 = vmul.f32 %v119_v36, %v73_v35  ;;  %v75_v40 = vld [vmem:[#allocation5 + $0x118] sm:$0xff]  ;;  %v121_v41 = vld [vmem:[#allocation2 + $0x118] sm:$0xff]  ;;  %210 = vst [vmem:[#allocation7 + $0xf8] sm:$0xff] %v163_v33  ;;  %v166_v42 = vmul.f32 %v120_v39, %v74_v37 }
  0x41   :  { %211 = vst [vmem:[#allocation7 + $0x100] sm:$0xff] %v164_v34  ;;  %v167_v43 = vmul.f32 %v121_v41, %v75_v40  ;;  %v76_v44 = vld [vmem:[#allocation5 + $0x120] sm:$0xff]  ;;  %v122_v45 = vld [vmem:[#allocation2 + $0x120] sm:$0xff]  ;;  %v77_v46 = vld [vmem:[#allocation5 + $0x128] sm:$0xff] }
  0x42   :  { %212 = vst [vmem:[#allocation7 + $0x108] sm:$0xff] %v165_v38  ;;  %v168_v47 = vmul.f32 %v122_v45, %v76_v44  ;;  %v123_v48 = vld [vmem:[#allocation2 + $0x128] sm:$0xff]  ;;  %v78_v49 = vld [vmem:[#allocation5 + $0x130] sm:$0xff]  ;;  %v124_v50 = vld [vmem:[#allocation2 + $0x130] sm:$0xff] }
  0x43   :  { %213 = vst [vmem:[#allocation7 + $0x110] sm:$0xff] %v166_v42  ;;  %214 = vst [vmem:[#allocation7 + $0x118] sm:$0xff] %v167_v43  ;;  %v169_v51 = vmul.f32 %v123_v48, %v77_v46  ;;  %v170_v52 = vmul.f32 %v124_v50, %v78_v49  ;;  %v79_v53 = vld [vmem:[#allocation5 + $0x138] sm:$0xff]  ;;  %v125_v54 = vld [vmem:[#allocation2 + $0x138] sm:$0xff] }
  0x44   :  { %v80_v55 = vld [vmem:[#allocation5 + $0x140] sm:$0xff]  ;;  %215 = vst [vmem:[#allocation7 + $0x120] sm:$0xff] %v168_v47  ;;  %v171_v56 = vmul.f32 %v125_v54, %v79_v53  ;;  %v126_v57 = vld [vmem:[#allocation2 + $0x140] sm:$0xff]  ;;  %v81_v58 = vld [vmem:[#allocation5 + $0x148] sm:$0xff] }
  0x45   :  { %v127_v59 = vld [vmem:[#allocation2 + $0x148] sm:$0xff]  ;;  %216 = vst [vmem:[#allocation7 + $0x128] sm:$0xff] %v169_v51  ;;  %217 = vst [vmem:[#allocation7 + $0x130] sm:$0xff] %v170_v52  ;;  %v172_v60 = vmul.f32 %v126_v57, %v80_v55  ;;  %v82_v62 = vld [vmem:[#allocation5 + $0x150] sm:$0xff] }
  0x46   :  { %v173_v61 = vmul.f32 %v127_v59, %v81_v58  ;;  %v128_v63 = vld [vmem:[#allocation2 + $0x150] sm:$0xff]  ;;  %v83_v0 = vld [vmem:[#allocation5 + $0x158] sm:$0xff]  ;;  %218 = vst [vmem:[#allocation7 + $0x138] sm:$0xff] %v171_v56  ;;  %v129_v2 = vld [vmem:[#allocation2 + $0x158] sm:$0xff] }
  0x47   :  { %v174_v1 = vmul.f32 %v128_v63, %v82_v62  ;;  %v84_v3 = vld [vmem:[#allocation5 + $0x160] sm:$0xff]  ;;  %v130_v4 = vld [vmem:[#allocation2 + $0x160] sm:$0xff]  ;;  %219 = vst [vmem:[#allocation7 + $0x140] sm:$0xff] %v172_v60  ;;  %v175_v5 = vmul.f32 %v129_v2, %v83_v0  ;;  %v85_v7 = vld [vmem:[#allocation5 + $0x168] sm:$0xff] }
  0x48   :  { %220 = vst [vmem:[#allocation7 + $0x148] sm:$0xff] %v173_v61  ;;  %v176_v6 = vmul.f32 %v130_v4, %v84_v3  ;;  %v131_v8 = vld [vmem:[#allocation2 + $0x168] sm:$0xff] }
  0x49   :  { %221 = vst [vmem:[#allocation7 + $0x150] sm:$0xff] %v174_v1  ;;  %v177_v9 = vmul.f32 %v131_v8, %v85_v7  ;;  %222 = vst [vmem:[#allocation7 + $0x158] sm:$0xff] %v175_v5 }
  0x4a   :  { %223 = vst [vmem:[#allocation7 + $0x160] sm:$0xff] %v176_v6 }
  0x4b   :  { %224 = vst.msk [vmem:[#allocation7 + $0x168] sm:$0xff] %vm200_vm0, %v177_v9 }
  0x4c   :  { %303 = shalt.err (!%p300_p6)
}
  0x4d   :  { %s304_s10 = scalar_lea.hbm %s389_s2, 5888 }
  0x4e   :  { %p305_p7 = scmp.ne.s32.totalorder %s389_s2, %s304_s10  ;;  %p308_p8 = scmp.lt.u32.totalorder %s304_s10, %s389_s2 }
  0x50   :  { %p310_p9 = pnand %p308_p8, %p305_p7 }
  0x52   :  { %313 = shalt.err (!%p310_p9)
}
  0x53   :  { %236 = dma.vmem_to_hbm [thread:$0]  %s231_s6, 5888, %s389_s2, [#allocation4], %s321_s19, %s321_s19, %s322_s20  }
  0x54   :  { %318 = dma.done.wait [#allocation4], 5888  }
  0x55   :  { %319 = vsyncadd [#allocation4], 4294961408 }
  0x56   :  { %240 = vsyncpa [#allocation3], 1 }
  0x57   :  { %241 = vsyncpa [#allocation6], 1 }
  0x58   :  { %242 = vsyncpa [#allocation4], 1 }

</bundles_post_ra>
